<compile_context>
chip_gen: v7x
topology: tpu7x:2x2x1
jax: 0.10.0
libtpu: 0.0.40
codegen_flags: <defaults>
</compile_context>

<pallas_src>
import math

import jax
import jax.numpy as jnp
from jax import lax
from jax.experimental import pallas as pl
from jax.experimental.pallas import tpu as pltpu


# ---------------------------------------------------------------------------
# helpers
# ---------------------------------------------------------------------------
def _pick_tile(total, align, cap):
    """Largest multiple of `align` that divides `total`, capped at `cap`.
    Falls back to `total` (full extent block, always legal) if none exists."""
    best = None
    t = align
    while t <= min(total, cap):
        if total % t == 0:
            best = t
        t += align
    return best if best is not None else total


# ---------------------------------------------------------------------------
# Pallas kernel 1: tiled pairwise squared distances
# ---------------------------------------------------------------------------
def _sqdist_kernel(x_ref, y_ref, xn_ref, yn_ref, out_ref):
    x = x_ref[0].astype(jnp.float32)                        # (TM, C)
    y = y_ref[0].astype(jnp.float32)                        # (TN, C)
    xy = lax.dot_general(x, y, (((1,), (1,)), ((), ())),
                         preferred_element_type=jnp.float32)  # (TM, TN)
    out_ref[0] = xn_ref[0] + yn_ref[0] - 2.0 * xy


def pairwise_sqdist(x, y, *, tile_m_cap=256, tile_n_cap=256):
    B, N, C = x.shape
    _, Ny, _ = y.shape
    # row norms hoisted out of the kernel (computed once, not per block)
    xn = jnp.sum(x * x, axis=-1, keepdims=True)             # (B, N, 1)
    yn = xn if y is x else jnp.sum(y * y, axis=-1, keepdims=True)
    yn = jnp.transpose(yn, (0, 2, 1))                       # (B, 1, Ny)

    tm = _pick_tile(N, 8, tile_m_cap)
    tn = _pick_tile(Ny, 128, tile_n_cap)
    grid = (B, N // tm, Ny // tn)

    return pl.pallas_call(
        _sqdist_kernel,
        out_shape=jax.ShapeDtypeStruct((B, N, Ny), jnp.float32),
        grid=grid,
        in_specs=[
            pl.BlockSpec((1, tm, C), lambda b, i, j: (b, i, 0)),
            pl.BlockSpec((1, tn, C), lambda b, i, j: (b, j, 0)),
            pl.BlockSpec((1, tm, 1), lambda b, i, j: (b, i, 0)),
            pl.BlockSpec((1, 1, tn), lambda b, i, j: (b, 0, j)),
        ],
        out_specs=pl.BlockSpec((1, tm, tn), lambda b, i, j: (b, i, j)),
        compiler_params=pltpu.CompilerParams(
            dimension_semantics=("parallel", "parallel", "parallel")),
    )(x, y, xn, yn)


# ---------------------------------------------------------------------------
# knn glue (top-k selection + gather in plain JAX)
# ---------------------------------------------------------------------------
def dil_knn(x, y, k=16, d=1, use_fsd=False):
    dst = pairwise_sqdist(x, y)                             # (B, N, N)
    neg_top, idx = jax.lax.top_k(-dst, k * d)               # ascending distance
    dst_k = -neg_top
    if d > 1:
        if use_fsd:
            idx = idx[:, :, k * (d - 1):k * d]
        else:
            idx = idx[:, :, ::d]
    return dst_k, idx


def knn_gather(x, idx):
    # x: (B, N, C), idx: (B, N, k) -> (B, N, k, C)
    # TODO(synk): fold this gather into the densgcn kernel (PrefetchScalarGridSpec
    # with idx in SMEM + manual DMA) to avoid materializing the k-expanded tensor.
    return jax.vmap(lambda xb, ib: xb[ib])(x, idx)


# ---------------------------------------------------------------------------
# Pallas kernel 2: fused densgcn hot path (bf16 matmuls, f32 accumulation)
# ---------------------------------------------------------------------------
def _densgcn_kernel(nb_ref, ct_ref, wc_ref, bc_ref, wdt_ref, bd_ref, out_ref):
    nb = nb_ref[0]                                          # (TM, C)   bf16
    ct_s = ct_ref[0]                                        # (TM/k, C) bf16
    tm, C = nb.shape
    tmc = ct_s.shape[0]
    kk = tm // tmc

    # Expand central rows to the k-replicated neighbor rows.  Done in f32 so the
    # broadcast+reshape is a clean (8,128)-tile layout op, then cast back.
    ct = jnp.broadcast_to(ct_s.astype(jnp.float32)[:, None, :],
                          (tmc, kk, C)).reshape(tm, C).astype(jnp.bfloat16)

    # Fused first stage (K = 2C):
    #   relu([nb | ct] @ [W1.T ; (W2 - W1).T] + (b1 + b2))
    #   == relu((nb - ct) @ W1.T + ct @ W2.T + b1 + b2)
    xin = jnp.concatenate([nb, ct], axis=-1)                # (TM, 2C) bf16
    y = jnp.dot(xin, wc_ref[...], preferred_element_type=jnp.float32)
    y = jnp.maximum(y + bc_ref[...], 0.0)                   # (TM, C) f32
    y_b = y.astype(jnp.bfloat16)

    # Dense layers (single K = 2C matmul each):  feats <- [feats | y] @ Wd.T + bd
    feats = y
    feats_b = y_b
    n_dense = wdt_ref.shape[0]                              # static unroll
    for i in range(n_dense):
        cat = jnp.concatenate([feats_b, y_b], axis=-1)      # (TM, 2C) bf16
        feats = jnp.dot(cat, wdt_ref[i],
                        preferred_element_type=jnp.float32) + bd_ref[i]
        if i + 1 < n_dense:
            feats_b = feats.astype(jnp.bfloat16)

    # Fused NCHW transpose: output block is (1, C, TM); XLU transpose is hidden
    # under the MXU work and keeps the output lane-dense.
    out_ref[0] = feats.T.astype(out_ref.dtype)


def densgcn_forward(f, k, params, n_layers=3, d=1, idx=None,
                    return_idx=True, tile_m_cap=2048):
    B, N, C = f.shape
    if idx is None:
        _, idx = dil_knn(f, f, k, d)
    kk = idx.shape[-1]
    NK = N * kk

    # Gather neighbor rows (XLA); central rows are NOT duplicated k times —
    # the kernel reads f directly and expands in VMEM.
    neighbors = knn_gather(f, idx)                          # (B, N, k, C)
    nb_rows = neighbors.reshape(B, NK, C).astype(jnp.bfloat16)
    f_ct = f.astype(jnp.bfloat16)                           # (B, N, C)

    w1, b1, w2, b2, wd, bd = params
    L = n_layers - 1
    # Fused first-stage weight / bias.
    wc = jnp.concatenate([w1.T, (w2 - w1).T], axis=0).astype(jnp.bfloat16)  # (2C, C)
    bc = (b1 + b2).reshape(1, C).astype(jnp.float32)
    # Dense layers kept as single (2C, C) tiles (concat order = [feats, y]).
    wdt = jnp.transpose(wd, (0, 2, 1)).astype(jnp.bfloat16)                  # (L, 2C, C)
    bdr = bd.reshape(L, 1, C).astype(jnp.float32)

    # Row tile: multiple of k (clean central sub-block), 8-sublane and 128-lane
    # aligned, as large as possible up to the cap; fall back to full extent.
    align = math.lcm(8 * kk, 128)
    tile_m = _pick_tile(NK, align, tile_m_cap)
    tmc = tile_m // kk
    grid = (B, NK // tile_m)

    out = pl.pallas_call(
        _densgcn_kernel,
        out_shape=jax.ShapeDtypeStruct((B, C, NK), f.dtype),
        grid=grid,
        in_specs=[
            pl.BlockSpec((1, tile_m, C), lambda b, i: (b, i, 0)),   # neighbor rows
            pl.BlockSpec((1, tmc, C),    lambda b, i: (b, i, 0)),   # central rows
            pl.BlockSpec((2 * C, C),     lambda b, i: (0, 0)),      # fused stage-1 W
            pl.BlockSpec((1, C),         lambda b, i: (0, 0)),      # fused bias
            pl.BlockSpec((L, 2 * C, C),  lambda b, i: (0, 0, 0)),   # dense W.T
            pl.BlockSpec((L, 1, C),      lambda b, i: (0, 0, 0)),   # dense biases
        ],
        out_specs=pl.BlockSpec((1, C, tile_m), lambda b, i: (b, 0, i)),
        compiler_params=pltpu.CompilerParams(
            dimension_semantics=("parallel", "parallel"),
            vmem_limit_bytes=32 * 1024 * 1024),
    )(nb_rows, f_ct, wc, bc, wdt, bdr)

    features = out.reshape(B, C, N, kk)     # already NCHW; reshape is free
    if return_idx:
        return features, idx
    return features


# ---------------------------------------------------------------------------
# pure-JAX reference (for correctness check)
# ---------------------------------------------------------------------------
def densgcn_ref(f, idx, params, n_layers=3):
    w1, b1, w2, b2, wd, bd = params
    hp = jax.lax.Precision.HIGHEST
    nb = jax.vmap(lambda xb, ib: xb[ib])(f, idx)            # (B,N,k,C)
    ct = jnp.broadcast_to(f[:, :, None, :], nb.shape)
    msg = jnp.einsum('bnkc,oc->bnko', nb - ct, w1, precision=hp) + b1
    fc = jnp.einsum('bnkc,oc->bnko', ct, w2, precision=hp) + b2
    y = jax.nn.relu(fc + msg)
    feats = y
    for i in range(n_layers - 1):
        cat = jnp.concatenate([feats, y], axis=-1)
        feats = jnp.einsum('bnkc,oc->bnko', cat, wd[i], precision=hp) + bd[i]
    return feats.transpose(0, 3, 1, 2)                      # (B, C, N, k)


# ---------------------------------------------------------------------------
# deterministic parameter init
# ---------------------------------------------------------------------------
def init_params(key, C, n_layers):
    ks = jax.random.split(key, 6)
    s = 1.0 / jnp.sqrt(jnp.float32(C))
    s2 = 1.0 / jnp.sqrt(jnp.float32(2 * C))
    w1 = jax.random.uniform(ks[0], (C, C), jnp.float32, -s, s)
    b1 = jax.random.uniform(ks[1], (C,), jnp.float32, -s, s)
    w2 = jax.random.uniform(ks[2], (C, C), jnp.float32, -s, s)
    b2 = jax.random.uniform(ks[3], (C,), jnp.float32, -s, s)
    wd = jax.random.uniform(ks[4], (n_layers - 1, C, 2 * C), jnp.float32, -s2, s2)
    bd = jax.random.uniform(ks[5], (n_layers - 1, C), jnp.float32, -s2, s2)
    return (w1, b1, w2, b2, wd, bd)


if __name__ == "__main__":
    B, N, C, k, n_layers = 2, 64, 128, 8, 3
    key = jax.random.PRNGKey(0)
    kf, kp = jax.random.split(key)
    f = jax.random.normal(kf, (B, N, C), jnp.float32)       # (B, N, C) features
    params = init_params(kp, C, n_layers)

    features, idx = densgcn_forward(f, k, params, n_layers=n_layers)
    features = jax.block_until_ready(features)
    idx = jax.block_until_ready(idx)
    assert features.shape == (B, C, N, k)
    assert idx.shape == (B, N, k)

    ref = densgcn_ref(f, idx, params, n_layers=n_layers)
    err = float(jnp.max(jnp.abs(features - ref)))
    if not (err < 5e-2):
        raise AssertionError(f"kernel/reference mismatch, max abs err = {err}")
    print("KERNEL_OK")
</pallas_src>

<mosaic_0001>
module attributes {stable_mosaic.version = 11 : i64} {
  func.func @_sqdist_kernel(%arg0: i32, %arg1: i32, %arg2: i32, %arg3: memref<1x64x128xf32, #tpu.memory_space<vmem>>, %arg4: memref<1x64x128xf32, #tpu.memory_space<vmem>>, %arg5: memref<1x64x1xf32, #tpu.memory_space<vmem>>, %arg6: memref<1x1x64xf32, #tpu.memory_space<vmem>>, %arg7: memref<1x64x64xf32, #tpu.memory_space<vmem>>) attributes {dimension_semantics = [#tpu.dimension_semantics<parallel>, #tpu.dimension_semantics<parallel>, #tpu.dimension_semantics<parallel>], iteration_bounds = array<i64: 2, 1, 1>, scalar_prefetch = 0 : i64, scratch_operands = 0 : i64, tpu.core_type = #tpu.core_type<tc>, window_params = [{transform_indices = @transform_0, window_bounds = array<i64: 1, 64, 128>}, {transform_indices = @transform_1, window_bounds = array<i64: 1, 64, 128>}, {transform_indices = @transform_2, window_bounds = array<i64: 1, 64, 1>}, {transform_indices = @transform_3, window_bounds = array<i64: 1, 1, 64>}, {transform_indices = @transform_4, window_bounds = array<i64: 1, 64, 64>}]} {
    %c0 = arith.constant 0 : index
    %c0_0 = arith.constant 0 : index
    %c0_1 = arith.constant 0 : index
    %0 = vector.load %arg3[%c0, %c0_0, %c0_1] : memref<1x64x128xf32, #tpu.memory_space<vmem>>, vector<1x64x128xf32>
    %1 = vector.shape_cast %0 : vector<1x64x128xf32> to vector<64x128xf32>
    %c0_2 = arith.constant 0 : index
    %c0_3 = arith.constant 0 : index
    %c0_4 = arith.constant 0 : index
    %2 = vector.load %arg4[%c0_2, %c0_3, %c0_4] : memref<1x64x128xf32, #tpu.memory_space<vmem>>, vector<1x64x128xf32>
    %3 = vector.shape_cast %2 : vector<1x64x128xf32> to vector<64x128xf32>
    %cst = arith.constant dense<0.000000e+00> : vector<64x64xf32>
    %4 = tpu.matmul %1, %3, %cst {dimension_numbers = #tpu.dot_dimension_numbers<[1], [1], [0], [0], [0, 0, 1, 0], [], []>} : vector<64x128xf32>, vector<64x128xf32>, vector<64x64xf32> -> vector<64x64xf32>
    %c0_5 = arith.constant 0 : index
    %c0_6 = arith.constant 0 : index
    %c0_7 = arith.constant 0 : index
    %5 = vector.load %arg5[%c0_5, %c0_6, %c0_7] : memref<1x64x1xf32, #tpu.memory_space<vmem>>, vector<1x64x1xf32>
    %6 = vector.shape_cast %5 : vector<1x64x1xf32> to vector<64x1xf32>
    %c0_8 = arith.constant 0 : index
    %c0_9 = arith.constant 0 : index
    %c0_10 = arith.constant 0 : index
    %7 = vector.load %arg6[%c0_8, %c0_9, %c0_10] : memref<1x1x64xf32, #tpu.memory_space<vmem>>, vector<1x1x64xf32>
    %8 = vector.shape_cast %7 : vector<1x1x64xf32> to vector<1x64xf32>
    %9 = vector.broadcast %6 : vector<64x1xf32> to vector<64x64xf32>
    %10 = vector.broadcast %8 : vector<1x64xf32> to vector<64x64xf32>
    %11 = arith.addf %9, %10 : vector<64x64xf32>
    %cst_11 = arith.constant 2.000000e+00 : f32
    %12 = vector.broadcast %cst_11 : f32 to vector<64x64xf32>
    %13 = arith.mulf %12, %4 : vector<64x64xf32>
    %14 = arith.subf %11, %13 : vector<64x64xf32>
    %c0_12 = arith.constant 0 : index
    %c0_13 = arith.constant 0 : index
    %c0_14 = arith.constant 0 : index
    %15 = vector.load %arg7[%c0_12, %c0_13, %c0_14] : memref<1x64x64xf32, #tpu.memory_space<vmem>>, vector<1x64x64xf32>
    %16 = vector.shape_cast %15 : vector<1x64x64xf32> to vector<64x64xf32>
    %17 = vector.shape_cast %14 : vector<64x64xf32> to vector<1x64x64xf32>
    tpu.vector_store %arg7[%c0_12, %c0_13, %c0_14], %17 {strides = array<i32>} : memref<1x64x64xf32, #tpu.memory_space<vmem>>, vector<1x64x64xf32>,
    return
  }
  func.func @transform_0(%arg0: i32, %arg1: i32, %arg2: i32) -> (i32, i32, i32) {
    %c0_i32 = arith.constant 0 : i32
    %c0_i32_0 = arith.constant 0 : i32
    return %arg0, %arg1, %c0_i32 : i32, i32, i32
  }
  func.func @transform_1(%arg0: i32, %arg1: i32, %arg2: i32) -> (i32, i32, i32) {
    %c0_i32 = arith.constant 0 : i32
    %c0_i32_0 = arith.constant 0 : i32
    return %arg0, %arg2, %c0_i32 : i32, i32, i32
  }
  func.func @transform_2(%arg0: i32, %arg1: i32, %arg2: i32) -> (i32, i32, i32) {
    %c0_i32 = arith.constant 0 : i32
    %c0_i32_0 = arith.constant 0 : i32
    return %arg0, %arg1, %c0_i32 : i32, i32, i32
  }
  func.func @transform_3(%arg0: i32, %arg1: i32, %arg2: i32) -> (i32, i32, i32) {
    %c0_i32 = arith.constant 0 : i32
    %c0_i32_0 = arith.constant 0 : i32
    return %arg0, %c0_i32, %arg2 : i32, i32, i32
  }
  func.func @transform_4(%arg0: i32, %arg1: i32, %arg2: i32) -> (i32, i32, i32) {
    %c0_i32 = arith.constant 0 : i32
    return %arg0, %arg1, %arg2 : i32, i32, i32
  }
}

</mosaic_0001>

<bundles_post_ra>
// kernel: tpu_custom_call.1
= control target key start
LH: loop header
LB: loop body
LE: loop exit
PB: predicated region body
PF: predicated region fallthrough
CT: control target
= control target key end

     0   :  { %9 = vsyncpa [#allocation3], 0  ;;  %s1246_s0 = inlined_call_operand.vmem [shape: f32[2,64,128], index: 0, kind: input, shape index: {}]   ;;  %s1247_s1 = inlined_call_operand.hbm [shape: f32[2,64,128], index: 1, kind: input, shape index: {}]   ;;  %s1248_s2 = inlined_call_operand.vmem [shape: f32[2,64,1], index: 2, kind: input, shape index: {}]   ;;  %s1249_s3 = inlined_call_operand.vmem [shape: f32[2,1,64], index: 3, kind: input, shape index: {}]   ;;  %s1250_s4 = inlined_call_operand.hbm [shape: f32[2,64,64], index: 4, kind: output, shape index: {}]  }
   0x1   :  { %11 = vsyncpa [#allocation3 + $0x1], 0 }
   0x2   :  { %12 = vsyncpa [#allocation4], 0 }
   0x3   :  { %14 = vsyncpa [#allocation4 + $0x1], 0  ;;  %s1014_s15 = smov 0   ;;  %s1016_s16 = smov 0  }
   0x4   :  { %s1018_s17 = smov 0   ;;  %s1020_s18 = smov 0  }
   0x5   :  { %s1022_s19 = smov 0   ;;  %s1024_s20 = smov 0  }
   0x6 LB: > { %s707_s21 = sadd.s32 4294967295, %s980_s20   ;;  %s708_s22 = sadd.s32 4294967294, %s980_s20   ;;  %s980_s20 = sphi %s1024_s20, %s20_s20   ;;  %s976_s19 = sphi %s1022_s19, %s1265_s19   ;;  %s972_s18 = sphi %s1020_s18, %s1264_s18   ;;  %s968_s17 = sphi %s1018_s17, %s1263_s17   ;;  %s964_s16 = sphi %s1016_s16, %s1262_s16   ;;  %s960_s15 = sphi %s1014_s15, %s1261_s15  }
   0x7   : > { %s39_s23 = sadd.s32 1, %s976_s19  ;;  %s76_s24 = sadd.s32 1, %s968_s17 }
   0x8   : > { %p41_p0 = scmp.ge.s32.totalorder %s39_s23, 2  ;;  %p83_p1 = scmp.ne.s32.totalorder %s968_s17, %s964_s16 }
   0x9   : > { %p84_p2 = scmp.eq.s32.totalorder %s980_s20, 0  ;;  %p89_p3 = scmp.ne.s32.totalorder %s964_s16, %s960_s15 }
   0xa   : > { %s1267_s23 = smov (%p41_p0, %s39_s23), 0  ;;  %p90_p5 = scmp.eq.s32.totalorder %s707_s21, 0 }
   0xb   : > { %p1055_p4 = por %p84_p2, %p83_p1  ;;  %s71_s26 = ssub.s32 %s976_s19, %s1267_s23 }
   0xc   : > { %p173_p6 = scmp.eq.s32.totalorder %s707_s21, 1  ;;  %p74_p7 = scmp.eq.s32.totalorder %s71_s26, 0 }
   0xd   : > { %p1061_p8 = por %p90_p5, %p89_p3  ;;  %p179_p10 = scmp.eq.s32.totalorder %s708_s22, 1 }
   0xe   : > { %p1065_p9 = por %p173_p6, %p83_p1  ;;  %p811_p13 = scmp.lt.s32.totalorder %s980_s20, 2 }
   0xf   : > { %s1070_s29 = scalar_select %p74_p7, %s968_s17, %s76_s24  }
  0x10   : > { %s1254_s28 = scalar_select %p1065_p9, 1, 0 }
  0x11   : > { %p1072_p11 = por %p179_p10, %p89_p3  ;;  %s212_s5 = sand.u32 1, %s968_s17  }
  0x12   : > { %s711_s6 = sshll.u32 %s212_s5, 6  ;;  %s727_s7 = sshll.u32 %s976_s19, 10 }
  0x13   : > { %s1255_s30 = scalar_select %p1072_p11, 1, 0 }
  0x14   : > { %s1083_s10 = scalar_lea.hbm %s1247_s1, %s727_s7  ;;  %s216_s11 = scalar_lea.vmem [#allocation2], %s711_s6 }
  0x15   : > { %s225_s12 = sshll.u32 %s216_s11, 4  ;;  %p1089_p0 = pnand %p811_p13, %p1055_p4  ;;  %s1085_s12 = int_to_ptr.vmem [resolvable:$true] %s225_s12 }
  0x16   : > { %s1094_s14 = scalar_lea.sflag [#allocation3], %s212_s5  ;;  %s868_s21 = scalar_lea.hbm %s1083_s10, 1024 }
  0x17   : > { %p869_p2 = scmp.ne.s32.totalorder %s1083_s10, %s868_s21  ;;  %p870_p3 = pneg %p1089_p0 }
  0x18   : > { %s873_s25 = scalar_lea.hbm %s1247_s1, 2048  ;;  %p874_p4 = scmp.lt.u32.totalorder %s1083_s10, %s1247_s1 }
  0x19   : > { %p871_p5 = pnand %p870_p3, %p869_p2  ;;  %p875_p7 = scmp.lt.u32.totalorder %s873_s25, %s868_s21 }
  0x1a   : > { %p877_p13 = scmp.lt.u32.totalorder %s868_s21, %s1083_s10 }
  0x1b   : > { %p872_p6 = pneg %p871_p5  ;;  %p876_p10 = por %p875_p7, %p874_p4 }
  0x1d   : > { %p878_p12 = por %p877_p13, %p876_p10 }
  0x1f   : > { %p879_p1 = pnand %p878_p12, %p872_p6 }
  0x21   : > { %882 = shalt.err (!%p879_p1)
}
  0x22   : > { %s883_s5 = scalar_lea.vmem %s1085_s12, 1024  ;;  %s982_s7 = smov [#allocation2]  }
  0x23   : > { %p884_p2 = scmp.ne.s32.totalorder %s1085_s12, %s883_s5  ;;  %s888_s8 = sshll.u32 %s982_s7, 4  ;;  %s889_s8 = int_to_ptr.vmem [resolvable:$false] %s888_s8 }
  0x24   : > { %s890_s9 = scalar_lea.vmem %s889_s8, 2048  ;;  %p891_p9 = scmp.lt.s32.totalorder %s1085_s12, %s889_s8 }
  0x25   : > { %p886_p5 = pnand %p884_p2, %p870_p3  ;;  %p892_p4 = scmp.lt.s32.totalorder %s890_s9, %s883_s5 }
  0x27   : > { %p887_p11 = pneg %p886_p5  ;;  %p893_p7 = por %p892_p4, %p891_p9 }
  0x29   : > { %p894_p10 = pnand %p893_p7, %p887_p11 }
  0x2b   : > { %897 = shalt.err (!%p894_p10)
}
  0x2c   : > { %s983_s11 = smov 128   ;;  %s984_s21 = smov 8  }
  0x2d   : > { %806 = dma.hbm_to_vmem [thread:$0]  (!%p1089_p0), %s1083_s10, 1024, %s1085_s12, %s1094_s14, %s983_s11, %s983_s11, %s984_s21  }
  0x2e   : > { %p255_p12 = scmp.lt.s32.totalorder %s980_s20, 3  ;;  %p1257_p1 = scmp.ge.s32.totalorder %s980_s20, 1 }
  0x30   : > { %p256_p3 = pnand %p1257_p1, %p255_p12 }
  0x31   : > { %s1126_s22 = sand.u32 (!%p256_p3), 1, %s964_s16  }
  0x32   : > { %259 = sbr.rel (%p256_p3) target bundleno = 329 (0x149), region = 36  ;;  %s715_s24 = sshll.u32 (!%p256_p3), %s1126_s22, 6 }
  0x33   : > { %s262_s25 = scalar_lea.sflag (!%p256_p3), [#allocation3], %s1126_s22  ;;  %s1132_s26 = scalar_lea.vmem (!%p256_p3), [#allocation2], %s715_s24 }
  0x39   : > { %951 = dma.done.wait (%p1061_p8), %s262_s25, 1024  }
  0x3a   : > { %953 = vsyncadd (%p1061_p8), %s262_s25, 4294966272  ;;  %p315_p9 = scmp.lt.s32.totalorder %s972_s18, 1  ;;  %v985_v0 = vmov 0   ;;  %v350_v1 = vld [vmem:[%s1132_s26] sm:$0xff]  ;;  %v351_v2 = vld [vmem:[%s1132_s26 + $0x8] sm:$0xff]  ;;  %vm542_vm0 = vcmask 523264  }
  0x3b   : > { %867 = vset.pattern.permute.xlu1 %v985_v0  ;;  %866 = vset.pattern.permute.xlu0 %v985_v0  ;;  %v352_v3 = vld [vmem:[%s1132_s26 + $0x10] sm:$0xff]  ;;  %v775_v4 = vpack.c.bf16 %v351_v2, %v350_v1  ;;  %v353_v5 = vld [vmem:[%s1132_s26 + $0x18] sm:$0xff]  ;;  %v354_v11 = vld [vmem:[%s1132_s26 + $0x20] sm:$0xff]  ;;  %s730_s21 = sshll.u32 %s972_s18, 10  ;;  %s313_s25 = scalar_lea.vmem [#allocation5], %s715_s24 }
  0x3c   : > { %s1140_s10 = scalar_select %p315_p9, %s972_s18, 1  ;;  %v779_v6 = vpack.c.bf16 %v353_v5, %v352_v3  ;;  %v355_v12 = vld [vmem:[%s1132_s26 + $0x28] sm:$0xff]  ;;  %v356_v18 = vld [vmem:[%s1132_s26 + $0x30] sm:$0xff]  ;;  %v357_v19 = vld [vmem:[%s1132_s26 + $0x38] sm:$0xff] }
  0x3d   : > { %776 = vmatprep.subr.bf16.mxu0 %v775_v4  ;;  %791 = vmatprep.subr.bf16.mxu1 %v775_v4  ;;  %v783_v15 = vpack.c.bf16 %v355_v12, %v354_v11  ;;  %v787_v22 = vpack.c.bf16 %v357_v19, %v356_v18  ;;  %s568_s26 = sshll.u32 %s313_s25, 4  ;;  %p1258_p11 = scmp.ne.s32.totalorder %s1254_s28, 0  ;;  %s1193_s26 = int_to_ptr.vmem [resolvable:$true] %s568_s26 }
  0x3e   : > { %s728_s12 = sshll.u32 %s1140_s10, 6  ;;  %778 = vmatpush3.bf16.xpose.msra.mxu0 %v775_v4  ;;  %795 = vmatpush3.bf16.xpose.msra.mxu1 %v775_v4  ;;  %s340_s11 = scalar_lea.vmem %s1249_s3, %s1140_s10 }
  0x3f   : > { %s1149_s14 = scalar_lea.vmem %s1246_s0, %s728_s12  ;;  %s1155_s7 = scalar_lea.vmem %s1248_s2, %s728_s12  ;;  %780 = vmatprep.subr.bf16.mxu0 %v779_v6  ;;  %792 = vmatprep.subr.bf16.mxu1 %v779_v6  ;;  %v721_v35 = vld [vmem:[%s340_s11] ss:$0 sm:$0xff] }
  0x40   : > { %v342_v7 = vld [vmem:[%s1149_s14] sm:$0xff]  ;;  %v465_v9 = vld [vmem:[%s1155_s7 + $0x10] sm:$0xff]  ;;  %v466_v13 = vld [vmem:[%s1155_s7 + $0x18] sm:$0xff]  ;;  %s1191_s10 = scalar_lea.hbm %s1250_s4, %s730_s21  ;;  %s552_s12 = scalar_lea.sflag [#allocation4], %s1126_s22 }
  0x41   : > { %v346_v8 = vld [vmem:[%s1149_s14 + $0x20] sm:$0xff]  ;;  %763 = vmatprep.mubr.f32.mxu0 %v342_v7  ;;  %484 = vperm.xlu1 %867, %v465_v9   ;;  %v464_v14 = vld [vmem:[%s1155_s7 + $0x8] sm:$0xff]  ;;  %v470_v20 = vld [vmem:[%s1155_s7 + $0x38] sm:$0xff]  ;;  %s898_s13 = scalar_lea.vmem %s1193_s26, 1024  ;;  %s986_s27 = smov [#allocation5]  }
  0x42   : > { %v463_v10 = vld [vmem:[%s1155_s7] sm:$0xff]  ;;  %769 = vmatprep.mubr.f32.mxu1 %v346_v8  ;;  %v468_v16 = vld [vmem:[%s1155_s7 + $0x28] sm:$0xff]  ;;  %v469_v21 = vld [vmem:[%s1155_s7 + $0x30] sm:$0xff]  ;;  %p899_p8 = scmp.ne.s32.totalorder %s1193_s26, %s898_s13 }
  0x43   : > { %474 = vperm.xlu0 %866, %v463_v10   ;;  %v467_v17 = vld [vmem:[%s1155_s7 + $0x20] sm:$0xff]  ;;  %v343_v23 = vld [vmem:[%s1149_s14 + $0x8] sm:$0xff]  ;;  %v344_v25 = vld [vmem:[%s1149_s14 + $0x10] sm:$0xff] }
  0x44   : > { %v347_v24 = vld [vmem:[%s1149_s14 + $0x28] sm:$0xff]  ;;  %v348_v26 = vld [vmem:[%s1149_s14 + $0x30] sm:$0xff]  ;;  %v345_v27 = vld [vmem:[%s1149_s14 + $0x18] sm:$0xff]  ;;  %p900_p0 = pnand %p899_p8, %p1258_p11 }
  0x45   : > { %489 = vperm.xlu1 %867, %v466_v13   ;;  %v349_v28 = vld [vmem:[%s1149_s14 + $0x38] sm:$0xff]  ;;  %s902_s14 = sshll.u32 %s986_s27, 4  ;;  %s903_s14 = int_to_ptr.vmem [resolvable:$false] %s902_s14 }
  0x46   : > { %782 = vmatpush3.bf16.xpose.msra.mxu0 %v779_v6  ;;  %796 = vmatpush3.bf16.xpose.msra.mxu1 %v779_v6  ;;  %p901_p6 = pneg %p900_p0  ;;  %s904_s6 = scalar_lea.vmem %s903_s14, 2048 }
  0x47   : > { %479 = vperm.xlu0 %866, %v464_v14   ;;  %784 = vmatprep.subr.bf16.mxu0 %v783_v15  ;;  %p905_p13 = scmp.lt.s32.totalorder %s1193_s26, %s903_s14  ;;  %p906_p2 = scmp.lt.s32.totalorder %s904_s6, %s898_s13 }
  0x48   : > { %793 = vmatprep.subr.bf16.mxu1 %v783_v15 }
  0x49   : > { %499 = vperm.xlu1 %867, %v468_v16   ;;  %p907_p5 = por %p906_p2, %p905_p13 }
  0x4b   : > { %494 = vperm.xlu0 %866, %v467_v17   ;;  %p908_p4 = pnand %p907_p5, %p901_p6 }
  0x4d   : > { %509 = vperm.xlu1 %867, %v470_v20  }
  0x4e   : > { %786 = vmatpush3.bf16.xpose.msra.mxu0 %v783_v15  ;;  %797 = vmatpush3.bf16.xpose.msra.mxu1 %v783_v15 }
  0x4f   : > { %504 = vperm.xlu0 %866, %v469_v21   ;;  %788 = vmatprep.subr.bf16.mxu0 %v787_v22 }
  0x50   : > { %794 = vmatprep.subr.bf16.mxu1 %v787_v22 }
  0x56   : > { %790 = vmatpush3.bf16.xpose.msra.mxu0 %v787_v22  ;;  %798 = vmatpush3.bf16.xpose.msra.mxu1 %v787_v22 }
  0x5d   : > { %764 = vmatmul.mubr.f32.vlgmr.msra.gmra.mrb[0].mxu0 %v343_v23  ;;  %770 = vmatmul.mubr.f32.vlgmr.msra.gmra.mrb[0].mxu1 %v347_v24 }
  0x5e   : > { %766 = vmatprep.mubr.f32.mxu0 %v344_v25  ;;  %772 = vmatprep.mubr.f32.mxu1 %v348_v26 }
  0x61   : > { %767 = vmatmul.mubr.f32.gmra.mrb[2].mxu0 %v345_v27  ;;  %773 = vmatmul.mubr.f32.gmra.mrb[2].mxu1 %v349_v28 }
  0xc0   : > { %v485_v29 = vpop.permute.xlu1 %484 }
  0xc1   : > { %v520_v62 = vadd.f32 %v721_v35, %v485_v29 }
  0xc2   : > { %v475_v30 = vpop.permute.xlu0 %474 }
  0xc3   : > { %v518_v44 = vadd.f32 %v721_v35, %v475_v30 }
  0xc4   : > { %v490_v31 = vpop.permute.xlu1 %489 }
  0xc5   : > { %v521_v56 = vadd.f32 %v721_v35, %v490_v31 }
  0xc6   : > { %v480_v32 = vpop.permute.xlu0 %479 }
  0xc7   : > { %v519_v38 = vadd.f32 %v721_v35, %v480_v32 }
  0xc8   : > { %v500_v33 = vpop.permute.xlu1 %499 }
  0xc9   : > { %v523_v39 = vadd.f32 %v721_v35, %v500_v33 }
  0xca   : > { %v495_v34 = vpop.permute.xlu0 %494 }
  0xcb   : > { %v522_v45 = vadd.f32 %v721_v35, %v495_v34 }
  0xcc   : > { %v510_v46 = vpop.permute.xlu1 %509 }
  0xcd   : > { %v525_v57 = vadd.f32 %v721_v35, %v510_v46 }
  0xce   : > { %v505_v49 = vpop.permute.xlu0 %504 }
  0xcf   : > { %v524_v63 = vadd.f32 %v721_v35, %v505_v49 }
 0x130   : > { %v765_v36 = vpop.f32.mrb[0].mxu0  ;;  %v771_v37 = vpop.f32.mrb[0].mxu1 }
 0x131   : > { %v527_v40 = vmul.f32 2.0, %v765_v36  ;;  %v531_v41 = vmul.f32 2.0, %v771_v37  ;;  %v424_v42 = vpop.f32.mrb[1].mxu0  ;;  %v444_v43 = vpop.f32.mrb[1].mxu1 }
 0x132   : > { %v526_v47 = vmul.f32 2.0, %v424_v42  ;;  %v530_v48 = vmul.f32 2.0, %v444_v43 }
 0x133   : > { %v535_v50 = vsub.f32 %v519_v38, %v527_v40  ;;  %v539_v51 = vsub.f32 %v523_v39, %v531_v41 }
 0x134   : > { %v534_v52 = vsub.f32 %v518_v44, %v526_v47  ;;  %v538_v53 = vsub.f32 %v522_v45, %v530_v48  ;;  %v768_v54 = vpop.f32.mrb[2].mxu0  ;;  %v774_v55 = vpop.f32.mrb[2].mxu1 }
 0x135   : > { %544 = vst.msk [vmem:[%s313_s25 + $0x8] sm:$0xff] %vm542_vm0, %v535_v50  ;;  %548 = vst.msk [vmem:[%s313_s25 + $0x28] sm:$0xff] %vm542_vm0, %v539_v51  ;;  %v529_v58 = vmul.f32 2.0, %v768_v54  ;;  %v533_v59 = vmul.f32 2.0, %v774_v55  ;;  %v434_v60 = vpop.f32.mrb[3].mxu0  ;;  %v454_v61 = vpop.f32.mrb[3].mxu1 }
 0x136   : > { %543 = vst.msk [vmem:[%s313_s25] sm:$0xff] %vm542_vm0, %v534_v52  ;;  %547 = vst.msk [vmem:[%s313_s25 + $0x20] sm:$0xff] %vm542_vm0, %v538_v53  ;;  %v528_v0 = vmul.f32 2.0, %v434_v60  ;;  %v532_v1 = vmul.f32 2.0, %v454_v61 }
 0x137   : > { %v537_v2 = vsub.f32 %v521_v56, %v529_v58  ;;  %v541_v3 = vsub.f32 %v525_v57, %v533_v59 }
 0x138   : > { %v536_v4 = vsub.f32 %v520_v62, %v528_v0  ;;  %v540_v5 = vsub.f32 %v524_v63, %v532_v1 }
 0x139   : > { %546 = vst.msk [vmem:[%s313_s25 + $0x18] sm:$0xff] %vm542_vm0, %v537_v2  ;;  %550 = vst.msk [vmem:[%s313_s25 + $0x38] sm:$0xff] %vm542_vm0, %v541_v3 }
 0x13a   : > { %545 = vst.msk [vmem:[%s313_s25 + $0x10] sm:$0xff] %vm542_vm0, %v536_v4  ;;  %549 = vst.msk [vmem:[%s313_s25 + $0x30] sm:$0xff] %vm542_vm0, %v540_v5 }
 0x13b   : > { %911 = shalt.err (!%p908_p4)
}
 0x13c   : > { %s912_s5 = scalar_lea.hbm %s1191_s10, 1024  ;;  %s916_s9 = scalar_lea.hbm %s1250_s4, 2048 }
 0x13d   : > { %p913_p7 = scmp.ne.s32.totalorder %s1191_s10, %s912_s5  ;;  %p917_p1 = scmp.lt.u32.totalorder %s1191_s10, %s1250_s4 }
 0x13e   : > { %p918_p3 = scmp.lt.u32.totalorder %s916_s9, %s912_s5  ;;  %p920_p8 = scmp.lt.u32.totalorder %s912_s5, %s1191_s10 }
 0x13f   : > { %p914_p10 = pnand %p913_p7, %p1258_p11 }
 0x140   : > { %p919_p9 = por %p918_p3, %p917_p1 }
 0x141   : > { %p915_p12 = pneg %p914_p10 }
 0x142   : > { %p921_p0 = por %p920_p8, %p919_p9 }
 0x144   : > { %p922_p6 = pnand %p921_p0, %p915_p12 }
 0x146   : > { %925 = shalt.err (!%p922_p6)
}
 0x147   : > { %s987_s25 = smov 128   ;;  %s988_s18 = smov 8  }
 0x148   : > { %801 = dma.vmem_to_hbm [thread:$0]  (%p1258_p11), %s1193_s26, 1024, %s1191_s10, %s552_s12, %s987_s25, %s987_s25, %s988_s18  }
 0x149 PF: > { %s583_s24 = sand.u32 1, %s960_s15   ;;  %p1259_p13 = scmp.ne.s32.totalorder %s1255_s30, 0 }
 0x14a   : > { %p1260_p2 = scmp.ge.s32.totalorder %s980_s20, 2  ;;  %s584_s13 = scalar_lea.sflag [#allocation4], %s583_s24 }
 0x14c   : > { %p808_p5 = pnand %p1260_p2, %p1259_p13 }
 0x14e   : > { %955 = dma.done.wait (!%p808_p5), %s584_s13, 1024  }
 0x14f   : > { %957 = vsyncadd (!%p808_p5), %s584_s13, 4294966272  ;;  %s20_s20 = sadd.s32 1, %s980_s20   ;;  %s1261_s15 = smov %s964_s16 }
 0x150   : > { %p17_p4 = scmp.ge.s32.totalorder %s20_s20, 4   ;;  %s1262_s16 = smov %s968_s17 }
 0x151   : > { %s1263_s17 = smov %s1070_s29  ;;  %s1264_s18 = smov %s976_s19 }
 0x152   : > { %s1265_s19 = smov %s1267_s23  ;;  %19 = sbr.rel (!%p17_p4) target bundleno = 6 (0x6), region = 90 }
 0x159   :  { %589 = vsyncpa [#allocation3], 1 }
 0x15a   :  { %591 = vsyncpa [#allocation3 + $0x1], 1 }
 0x15b   :  { %592 = vsyncpa [#allocation4], 1 }
 0x15c   :  { %594 = vsyncpa [#allocation4 + $0x1], 1 }

</bundles_post_ra>
